<compile_context>
chip_gen: v7x
topology: tpu7x:2x2x1
jax: 0.10.0
libtpu: 0.0.40
codegen_flags: <defaults>
</compile_context>

<pallas_src>
import functools

import jax
import jax.numpy as jnp
from jax.experimental import pallas as pl
from jax.experimental.pallas import tpu as pltpu

_MIB = 1024 * 1024


def _vmem_budgets():
    """(tile data budget, vmem_limit cap) sized for the current TPU generation."""
    try:
        vmem_bytes = int(pltpu.get_tpu_info().vmem_capacity_bytes)
    except Exception:
        vmem_bytes = 64 * _MIB  # conservative fallback (v7x per-TC size)
    if vmem_bytes >= 96 * _MIB:
        # v5e / v6e: 128 MiB physical VMEM (scoped default is much lower).
        return 92 * _MIB, 100 * _MIB
    # v7x: 64 MiB per TensorCore; leave headroom for Mosaic internal scratch.
    return 44 * _MIB, 52 * _MIB


def _choose_tile_n(n, c, itemsize, data_budget):
    """Largest row tile whose double-buffered VMEM footprint fits the budget,
    rounded to the dtype's sublane packing, capped so the grid has >= 2
    (target ~4) steps for v7x megacore sharding."""
    sublane = max(8, 32 // max(1, itemsize))     # 8 f32 / 16 bf16 / 32 int8
    c_pad = -(-c // 128) * 128                   # lane padding of logits tile
    # 2 pipeline buffers each for logits and the lane-padded targets tile.
    per_row_bytes = 2 * (c_pad * itemsize + 128 * 4)
    tile = data_budget // per_row_bytes
    tile = int(max(sublane, min(tile, 8192)))
    tile = (tile // sublane) * sublane

    if n <= sublane:
        return n                                 # too small to split

    # Force >= 2 grid steps (aim for 4) so the "parallel" batch axis can be
    # split across v7x's two TensorCores; negligible cost elsewhere.
    quarter = -(-n // 4)
    quarter = -(-quarter // sublane) * sublane
    tile = min(tile, max(quarter, sublane))
    return max(tile, sublane)


def _dwce_kernel(logits_ref, tgt_ref, part_ref, *, tile_n, n_total):
    """One grid step: (TN, C) logits + (TN, 2) targets -> one partial sum,
    broadcast into a lane-dense (1, 1, 128) block. Stateless, so the grid
    axis stays 'parallel'."""
    i = pl.program_id(0)

    x = logits_ref[...].astype(jnp.float32)        # (TN, C), bf16 upcast here
    tgt = tgt_ref[...]                             # (TN, 2) int32
    tn, c = x.shape

    t0 = tgt[:, 0:1]                               # (TN, 1) primary class id
    t1 = tgt[:, 1:2]                               # (TN, 1) sub-target id

    # Numerically stable log-softmax pieces (row-wise over the class axis).
    m = jnp.max(x, axis=1, keepdims=True)                          # (TN, 1)
    lse = jnp.log(jnp.sum(jnp.exp(x - m), axis=1, keepdims=True))  # (TN, 1)

    # Gather the logit at the primary target class via iota-compare.
    cls = jax.lax.broadcasted_iota(jnp.int32, (tn, c), 1)
    xg = jnp.sum(jnp.where(cls == t0, x, 0.0), axis=1, keepdims=True)  # (TN, 1)

    # weight * (-log_softmax at target): weight only differs when t0 == t1.
    w = 1.0 + 2.0 * (t0 == t1).astype(jnp.float32)                 # (TN, 1)
    per_row = w * (m + lse - xg)                                    # (TN, 1)

    # Mask the ragged tail with a select (NOT a multiply: padded rows can
    # contain Inf/NaN which a multiply would propagate).
    row = i * tile_n + jax.lax.broadcasted_iota(jnp.int32, (tn, 1), 0)
    per_row = jnp.where(row < n_total, per_row, 0.0)

    part = jnp.sum(per_row)                                         # scalar
    part_ref[...] = jnp.full(part_ref.shape, part, dtype=jnp.float32)


def _dwce_jax(outputs, targets):
    """Plain-JAX path mirroring the PyTorch forward. Used as the C<128
    fallback and as the correctness reference."""
    n, c = outputs.shape
    onehot0 = jax.nn.one_hot(targets[:, 0], c, dtype=jnp.float32)
    onehot1 = jax.nn.one_hot(targets[:, 1], c, dtype=jnp.float32)
    weight = 1.0 + 2.0 * onehot1
    log_sm = jax.nn.log_softmax(outputs.astype(jnp.float32), axis=1)
    loss = -onehot0 * log_sm
    return jnp.sum(weight * loss) / n


def dynamic_weighted_ce_loss(outputs, targets, *, tile_n=None, force_pallas=False):
    """outputs: (N, C) float (f32 or bf16); targets: (N, 2) int.
    Returns scalar float32."""
    n, c = outputs.shape
    assert targets.shape == (n, 2)
    targets = targets.astype(jnp.int32)

    if c < 128 and not force_pallas:
        # Tiny class axis: lane utilization <128/128 and 40-byte HBM bursts
        # make the kernel slower than fused XLA at this size.
        return _dwce_jax(outputs, targets)

    itemsize = jnp.dtype(outputs.dtype).itemsize
    data_budget, limit_cap = _vmem_budgets()
    if tile_n is None:
        tile_n = _choose_tile_n(n, c, itemsize, data_budget)
    num_tiles = -(-n // tile_n)

    # VMEM: double-buffered logits + (lane-padded) targets tiles + small output.
    c_pad = -(-c // 128) * 128
    vmem_need = 2 * (tile_n * c_pad * itemsize + tile_n * 128 * 4) + 4 * 128 * 4
    vmem_limit = int(max(min(vmem_need + 4 * _MIB, limit_cap), 16 * _MIB))

    cost = pl.CostEstimate(
        flops=int(5 * n * c),
        transcendentals=int(n * c + n),
        bytes_accessed=int(n * c * itemsize + n * 2 * 4 + num_tiles * 128 * 4),
    )

    kernel = functools.partial(_dwce_kernel, tile_n=tile_n, n_total=n)

    partials = pl.pallas_call(
        kernel,
        out_shape=jax.ShapeDtypeStruct((num_tiles, 1, 128), jnp.float32),
        grid_spec=pltpu.PrefetchScalarGridSpec(
            num_scalar_prefetch=0,
            grid=(num_tiles,),
            in_specs=[
                pl.BlockSpec((tile_n, c), lambda i: (i, 0)),   # logits tile
                pl.BlockSpec((tile_n, 2), lambda i: (i, 0)),   # targets tile
            ],
            out_specs=pl.BlockSpec((1, 1, 128), lambda i: (i, 0, 0)),
        ),
        compiler_params=pltpu.CompilerParams(
            dimension_semantics=("parallel",),
            vmem_limit_bytes=vmem_limit,
        ),
        cost_estimate=cost,
    )(outputs, targets)

    # Tiny final reduction + normalization in plain JAX.
    return jnp.sum(partials[:, 0, 0]) / jnp.float32(n)


if __name__ == "__main__":
    key = jax.random.PRNGKey(0)
    k_logits, k_t0, k_t1 = jax.random.split(key, 3)

    # --- Pallas path: small but lane-dense shape (C >= 128). ---
    N, C = 64, 256
    outputs = jax.random.normal(k_logits, (N, C), dtype=jnp.float32)
    t0 = jax.random.randint(k_t0, (N,), 0, C, dtype=jnp.int32)
    t1 = jax.random.randint(k_t1, (N,), 0, C, dtype=jnp.int32)
    targets = jnp.stack([t0, t1], axis=1)  # (N, 2) int32

    got = jax.block_until_ready(dynamic_weighted_ce_loss(outputs, targets))
    want = jax.block_until_ready(_dwce_jax(outputs, targets))
    assert jnp.allclose(got, want, rtol=1e-5, atol=1e-5), (got, want)

    # --- bf16 logits through the same kernel (per-tile upcast inside). ---
    outputs_bf16 = outputs.astype(jnp.bfloat16)
    got_b = jax.block_until_ready(dynamic_weighted_ce_loss(outputs_bf16, targets))
    want_b = jax.block_until_ready(_dwce_jax(outputs_bf16, targets))
    assert jnp.allclose(got_b, want_b, rtol=1e-3, atol=1e-3), (got_b, want_b)

    # --- Ragged batch + forced small tile (exercises the tail mask). ---
    N2 = 61
    outputs2 = jax.random.normal(k_logits, (N2, C), dtype=jnp.float32)
    targets2 = jnp.stack(
        [jax.random.randint(k_t0, (N2,), 0, C, dtype=jnp.int32),
         jax.random.randint(k_t1, (N2,), 0, C, dtype=jnp.int32)], axis=1)
    got2 = jax.block_until_ready(
        dynamic_weighted_ce_loss(outputs2, targets2, tile_n=16))
    want2 = jax.block_until_ready(_dwce_jax(outputs2, targets2))
    assert jnp.allclose(got2, want2, rtol=1e-5, atol=1e-5), (got2, want2)

    # --- Tiny-C shape from the original module (C=10): JAX fallback path. ---
    N3, C3 = 16, 10
    outputs3 = jax.random.normal(k_logits, (N3, C3), dtype=jnp.float32)
    targets3 = jnp.stack(
        [jax.random.randint(k_t0, (N3,), 0, C3, dtype=jnp.int32),
         jax.random.randint(k_t1, (N3,), 0, C3, dtype=jnp.int32)], axis=1)
    got3 = jax.block_until_ready(dynamic_weighted_ce_loss(outputs3, targets3))
    want3 = jax.block_until_ready(_dwce_jax(outputs3, targets3))
    assert jnp.allclose(got3, want3, rtol=1e-5, atol=1e-5), (got3, want3)

    print("KERNEL_OK")
</pallas_src>

<mosaic_0001>
module attributes {stable_mosaic.version = 11 : i64} {
  func.func @_dwce_kernel(%arg0: i32, %arg1: memref<16x256xf32, #tpu.memory_space<vmem>>, %arg2: memref<16x2xi32, #tpu.memory_space<vmem>>, %arg3: memref<1x1x128xf32, #tpu.memory_space<vmem>>) attributes {dimension_semantics = [#tpu.dimension_semantics<parallel>], iteration_bounds = array<i64: 4>, scalar_prefetch = 0 : i64, scratch_operands = 0 : i64, tpu.core_type = #tpu.core_type<tc>, window_params = [{transform_indices = @transform_0, window_bounds = array<i64: 16, 256>}, {transform_indices = @transform_1, window_bounds = array<i64: 16, 2>}, {transform_indices = @transform_2, window_bounds = array<i64: 1, 1, 128>}]} {
    %c0 = arith.constant 0 : index
    %c0_0 = arith.constant 0 : index
    %0 = vector.load %arg1[%c0, %c0_0] : memref<16x256xf32, #tpu.memory_space<vmem>>, vector<16x256xf32>
    %c0_1 = arith.constant 0 : index
    %c0_2 = arith.constant 0 : index
    %1 = vector.load %arg2[%c0_1, %c0_2] : memref<16x2xi32, #tpu.memory_space<vmem>>, vector<16x2xi32>
    %2 = vector.extract_strided_slice %1 {offsets = [0, 0], sizes = [16, 1], strides = [1, 1]} : vector<16x2xi32> to vector<16x1xi32>
    %3 = vector.extract_strided_slice %1 {offsets = [0, 1], sizes = [16, 1], strides = [1, 1]} : vector<16x2xi32> to vector<16x1xi32>
    %cst = arith.constant dense<0xFF800000> : vector<16xf32>
    %4 = vector.multi_reduction <maximumf>, %0, %cst [1] : vector<16x256xf32> to vector<16xf32>
    %5 = vector.shape_cast %4 : vector<16xf32> to vector<16x1xf32>
    %6 = vector.broadcast %5 : vector<16x1xf32> to vector<16x256xf32>
    %7 = arith.subf %0, %6 : vector<16x256xf32>
    %8 = math.exp %7 : vector<16x256xf32>
    %cst_3 = arith.constant dense<0.000000e+00> : vector<16xf32>
    %9 = vector.multi_reduction <add>, %8, %cst_3 [1] : vector<16x256xf32> to vector<16xf32>
    %10 = vector.shape_cast %9 : vector<16xf32> to vector<16x1xf32>
    %11 = math.log %10 : vector<16x1xf32>
    %12 = tpu.iota {dimensions = array<i32: 1>} : vector<16x256xi32>
    %13 = vector.broadcast %2 : vector<16x1xi32> to vector<16x256xi32>
    %14 = arith.cmpi eq, %12, %13 : vector<16x256xi32>
    %cst_4 = arith.constant 0.000000e+00 : f32
    %15 = vector.broadcast %cst_4 : f32 to vector<16x256xf32>
    %16 = arith.select %14, %0, %15 : vector<16x256xi1>, vector<16x256xf32>
    %cst_5 = arith.constant dense<0.000000e+00> : vector<16xf32>
    %17 = vector.multi_reduction <add>, %16, %cst_5 [1] : vector<16x256xf32> to vector<16xf32>
    %18 = vector.shape_cast %17 : vector<16xf32> to vector<16x1xf32>
    %19 = arith.cmpi eq, %2, %3 : vector<16x1xi32>
    %20 = arith.extui %19 : vector<16x1xi1> to vector<16x1xi32>
    %21 = arith.sitofp %20 : vector<16x1xi32> to vector<16x1xf32>
    %cst_6 = arith.constant 2.000000e+00 : f32
    %22 = vector.broadcast %cst_6 : f32 to vector<16x1xf32>
    %23 = arith.mulf %22, %21 : vector<16x1xf32>
    %cst_7 = arith.constant 1.000000e+00 : f32
    %24 = vector.broadcast %cst_7 : f32 to vector<16x1xf32>
    %25 = arith.addf %24, %23 : vector<16x1xf32>
    %26 = arith.addf %5, %11 : vector<16x1xf32>
    %27 = arith.subf %26, %18 : vector<16x1xf32>
    %28 = arith.mulf %25, %27 : vector<16x1xf32>
    %c16_i32 = arith.constant 16 : i32
    %29 = arith.muli %arg0, %c16_i32 : i32
    %30 = tpu.iota {dimensions = array<i32: 0>} : vector<16x1xi32>
    %31 = vector.broadcast %29 : i32 to vector<16x1xi32>
    %32 = arith.addi %31, %30 : vector<16x1xi32>
    %c64_i32 = arith.constant 64 : i32
    %33 = vector.broadcast %c64_i32 : i32 to vector<16x1xi32>
    %34 = arith.cmpi slt, %32, %33 : vector<16x1xi32>
    %cst_8 = arith.constant 0.000000e+00 : f32
    %35 = vector.broadcast %cst_8 : f32 to vector<16x1xf32>
    %36 = arith.select %34, %28, %35 : vector<16x1xi1>, vector<16x1xf32>
    %37 = vector.shape_cast %36 : vector<16x1xf32> to vector<1x16x1xf32>
    %cst_9 = arith.constant dense<0.000000e+00> : vector<1xf32>
    %38 = vector.multi_reduction <add>, %37, %cst_9 [1, 2] : vector<1x16x1xf32> to vector<1xf32>
    %39 = vector.shape_cast %38 : vector<1xf32> to vector<1x1x1xf32>
    %40 = vector.extract %39[0, 0, 0] : f32 from vector<1x1x1xf32>
    %41 = vector.broadcast %40 : f32 to vector<1x1x128xf32>
    %c0_10 = arith.constant 0 : index
    %c0_11 = arith.constant 0 : index
    %c0_12 = arith.constant 0 : index
    %42 = vector.load %arg3[%c0_10, %c0_11, %c0_12] : memref<1x1x128xf32, #tpu.memory_space<vmem>>, vector<1x1x128xf32>
    tpu.vector_store %arg3[%c0_10, %c0_11, %c0_12], %41 {strides = array<i32>} : memref<1x1x128xf32, #tpu.memory_space<vmem>>, vector<1x1x128xf32>,
    return
  }
  func.func @transform_0(%arg0: i32) -> (i32, i32) {
    %c0_i32 = arith.constant 0 : i32
    %c0_i32_0 = arith.constant 0 : i32
    return %arg0, %c0_i32 : i32, i32
  }
  func.func @transform_1(%arg0: i32) -> (i32, i32) {
    %c0_i32 = arith.constant 0 : i32
    %c0_i32_0 = arith.constant 0 : i32
    return %arg0, %c0_i32 : i32, i32
  }
  func.func @transform_2(%arg0: i32) -> (i32, i32, i32) {
    %c0_i32 = arith.constant 0 : i32
    %c0_i32_0 = arith.constant 0 : i32
    %c0_i32_1 = arith.constant 0 : i32
    return %arg0, %c0_i32, %c0_i32_0 : i32, i32, i32
  }
}

</mosaic_0001>

<bundles_post_ra>
// kernel: tpu_custom_call.1
= control target key start
LH: loop header
LB: loop body
LE: loop exit
PB: predicated region body
PF: predicated region fallthrough
CT: control target
= control target key end

     0   :  { %7 = vsyncpa [#allocation3], 0  ;;  %s762_s0 = inlined_call_operand.hbm [shape: f32[64,256], index: 0, kind: input, shape index: {}]   ;;  %s763_s1 = inlined_call_operand.vmem [shape: s32[64,2], index: 1, kind: input, shape index: {}]   ;;  %s764_s2 = inlined_call_operand.hbm [shape: f32[4,1,128], index: 2, kind: output, shape index: {}]  }
   0x1   :  { %9 = vsyncpa [#allocation3 + $0x1], 0 }
   0x2   :  { %10 = vsyncpa [#allocation4], 0 }
   0x3   :  { %12 = vsyncpa [#allocation4 + $0x1], 0  ;;  %s585_s9 = smov 0   ;;  %s587_s10 = smov 0  }
   0x4   :  { %s589_s11 = smov 0   ;;  %s591_s12 = smov 0  }
   0x5 LB: > { %s606_s13 = sadd.s32 4294967295, %s561_s12   ;;  %s379_s14 = sadd.s32 4294967294, %s561_s12   ;;  %s561_s12 = sphi %s591_s12, %s776_s12   ;;  %s557_s11 = sphi %s589_s11, %s775_s11   ;;  %s553_s10 = sphi %s587_s10, %s774_s10   ;;  %s549_s9 = sphi %s585_s9, %s773_s9  }
   0x6   : > { %s610_s15 = sadd.s32 1, %s561_s12   ;;  %s25_s16 = sadd.s32 1, %s557_s11 }
   0x7   : > { %s22_s17 = ssub.s32 %s561_s12, %s610_s15  ;;  %p32_p0 = scmp.ne.s32.totalorder %s557_s11, %s553_s10 }
   0x8   : > { %p23_p1 = scmp.eq.s32.totalorder %s22_s17, 0  ;;  %p33_p2 = scmp.eq.s32.totalorder %s561_s12, 0 }
   0x9   : > { %p38_p3 = scmp.ne.s32.totalorder %s553_s10, %s549_s9  ;;  %p39_p4 = scmp.eq.s32.totalorder %s606_s13, 0 }
   0xa   : > { %s622_s18 = scalar_select %p23_p1, %s557_s11, %s25_s16  }
   0xb   : > { %p624_p5 = por %p33_p2, %p32_p0  ;;  %p628_p6 = por %p39_p4, %p38_p3 }
   0xc   : > { %p88_p7 = scmp.eq.s32.totalorder %s606_s13, 3  ;;  %p94_p8 = scmp.eq.s32.totalorder %s379_s14, 3 }
   0xd   : > { %p412_p9 = scmp.lt.s32.totalorder %s561_s12, 4  ;;  %s114_s23 = sand.u32 1, %s557_s11  }
   0xe   : > { %p634_p10 = por %p88_p7, %p32_p0  ;;  %p638_p11 = por %p94_p8, %p38_p3 }
   0xf   : > { %s397_s24 = sshll.u32 %s561_s12, 9  ;;  %s382_s25 = sshll.u32 %s114_s23, 5 }
  0x10   : > { %s768_s21 = scalar_select %p634_p10, 1, 0 }
  0x11   : > { %s769_s22 = scalar_select %p638_p11, 1, 0 }
  0x12   : > { %s647_s28 = scalar_lea.hbm %s762_s0, %s397_s24  ;;  %s118_s29 = scalar_lea.vmem [#allocation2], %s382_s25 }
  0x13   : > { %s126_s30 = sshll.u32 %s118_s29, 4  ;;  %p651_p12 = pnand %p412_p9, %p624_p5  ;;  %s655_s30 = int_to_ptr.vmem [resolvable:$true] %s126_s30 }
  0x14   : > { %s657_s4 = scalar_lea.sflag [#allocation3], %s114_s23  ;;  %s465_s5 = scalar_lea.hbm %s647_s28, 512 }
  0x15   : > { %p466_p13 = scmp.ne.s32.totalorder %s647_s28, %s465_s5  ;;  %p467_p0 = pneg %p651_p12 }
  0x16   : > { %s470_s8 = scalar_lea.hbm %s762_s0, 2048  ;;  %p471_p3 = scmp.lt.u32.totalorder %s647_s28, %s762_s0 }
  0x17   : > { %p468_p1 = pnand %p467_p0, %p466_p13  ;;  %p472_p4 = scmp.lt.u32.totalorder %s470_s8, %s465_s5 }
  0x18   : > { %p474_p7 = scmp.lt.u32.totalorder %s465_s5, %s647_s28 }
  0x19   : > { %p469_p2 = pneg %p468_p1  ;;  %p473_p5 = por %p472_p4, %p471_p3 }
  0x1b   : > { %p475_p8 = por %p474_p7, %p473_p5 }
  0x1d   : > { %p476_p9 = pnand %p475_p8, %p469_p2 }
  0x1f   : > { %479 = shalt.err (!%p476_p9)
}
  0x20   : > { %s480_s17 = scalar_lea.vmem %s655_s30, 512  ;;  %s563_s19 = smov [#allocation2]  }
  0x21   : > { %p481_p13 = scmp.ne.s32.totalorder %s655_s30, %s480_s17  ;;  %s485_s23 = sshll.u32 %s563_s19, 4  ;;  %s486_s23 = int_to_ptr.vmem [resolvable:$false] %s485_s23 }
  0x22   : > { %s487_s24 = scalar_lea.vmem %s486_s23, 1024  ;;  %p488_p10 = scmp.lt.s32.totalorder %s655_s30, %s486_s23 }
  0x23   : > { %p483_p1 = pnand %p481_p13, %p467_p0  ;;  %p489_p3 = scmp.lt.s32.totalorder %s487_s24, %s480_s17 }
  0x25   : > { %p484_p11 = pneg %p483_p1  ;;  %p490_p4 = por %p489_p3, %p488_p10 }
  0x27   : > { %p491_p5 = pnand %p490_p4, %p484_p11 }
  0x29   : > { %494 = shalt.err (!%p491_p5)
}
  0x2a   : > { %s564_s25 = smov 256   ;;  %s565_s26 = smov 16  }
  0x2b   : > { %407 = dma.hbm_to_vmem [thread:$0]  (!%p651_p12), %s647_s28, 512, %s655_s30, %s657_s4, %s564_s25, %s564_s25, %s565_s26  }
  0x2c   : > { %p386_p0 = scmp.ge.s32.totalorder %s561_s12, 1  ;;  %p143_p2 = scmp.lt.s32.totalorder %s561_s12, 5 }
  0x2e   : > { %p144_p7 = pnand %p386_p0, %p143_p2 }
  0x2f   : > { %s688_s27 = sand.u32 (!%p144_p7), 1, %s553_s10  }
  0x30   : > { %147 = sbr.rel (%p144_p7) target bundleno = 608 (0x260), region = 28  ;;  %s387_s29 = sshll.u32 (!%p144_p7), %s688_s27, 5 }
  0x31   : > { %s150_s5 = scalar_lea.sflag (!%p144_p7), [#allocation3], %s688_s27  ;;  %s153_s6 = scalar_lea.vmem (!%p144_p7), [#allocation2], %s387_s29 }
  0x37   : > { %540 = dma.done.wait (%p628_p6), %s150_s5, 512  }
  0x38   : > { %542 = vsyncadd (%p628_p6), %s150_s5, 4294966784  ;;  %s388_s28 = sshll.u32 %s606_s13, 1  ;;  %v566_v0 = vmov 0   ;;  %v185_v1 = vld [vmem:[%s153_s6] sm:$0xff]  ;;  %v186_v2 = vld [vmem:[%s153_s6 + $0x8] sm:$0xff]  ;;  %v219_v12 = vlaneseq  ;;  %s567_s20 = smov 127  }
  0x39   : > { %451 = vset.pattern.permute.xlu1 %v566_v0  ;;  %p180_p10 = scmp.lt.s32.totalorder %s388_s28, 7  ;;  %452 = vset.pattern.permute.xlu0 %v566_v0  ;;  %v187_v3 = vld [vmem:[%s153_s6 + $0x10] sm:$0xff]  ;;  %v191_v4 = vmax.f32 %v185_v1, %v186_v2  ;;  %v188_v5 = vld [vmem:[%s153_s6 + $0x18] sm:$0xff]  ;;  %s392_s8 = sshll.u32 %s606_s13, 4  ;;  %v568_v46 = vmov 0.0   ;;  %vm273_vm8 = vcmask 7168  }
  0x3a   : > { %v194_v7 = vmax.f32 %v187_v3, %v188_v5  ;;  %v220_v18 = vand.u32 127, %v219_v12  ;;  %v264_v43 = vshrl.u32 %v219_v12, 7  ;;  %v266_v44 = vstv %s392_s8  ;;  %s177_s14 = scalar_lea.vmem [#allocation5], %s688_s27  ;;  %s721_s24 = scalar_lea.hbm %s764_s2, %s392_s8 }
  0x3b   : > { %s778_s28 = smov (!%p180_p10, %s388_s28), 7  ;;  %192 = vmax.xlane.f32.xlu0 %v191_v4  ;;  %s301_s16 = sshll.u32 %s177_s14, 4  ;;  %s714_s16 = int_to_ptr.vmem [resolvable:$true] %s301_s16 }
  0x3c   : > { %s389_s30 = sshll.u32 %s778_s28, 3  ;;  %v221_v21 = vadd.s32 128, %v220_v18  ;;  %v265_v48 = vadd.s32 8, %v264_v43  ;;  %v267_v54 = vadd.s32 %v266_v44, %v264_v43  ;;  %s289_s25 = scalar_lea.sflag [#allocation4], %s688_s27 }
  0x3d   : > { %s183_s7 = scalar_lea.vmem %s763_s1, %s389_s30  ;;  %s495_s26 = scalar_lea.vmem %s714_s16, 16 }
  0x3e   : > { %v700_v6 = vld [vmem:[%s183_s7] sm:$0xff]  ;;  %v703_v8 = vld [vmem:[%s183_s7 + $0x8] sm:$0xff]  ;;  %v268_v58 = vadd.s32 %v266_v44, %v265_v48  ;;  %vm269_vm6 = vcmp.lt.s32.totalorder %v267_v54, 64  ;;  %p496_p6 = scmp.ne.s32.totalorder %s714_s16, %s495_s26  ;;  %p771_p11 = scmp.ne.s32.totalorder %s768_s21, 0 }
  0x3f   : > { %223 = vperm.xlu1 %451, %v700_v6   ;;  %195 = vmax.xlane.f32.xlu0 %v194_v7  ;;  %s569_s29 = smov [#allocation5]  }
  0x40   : > { %vm270_vm7 = vcmp.lt.s32.totalorder %v268_v58, 64  ;;  %p497_p12 = pnand %p496_p6, %p771_p11  ;;  %s499_s5 = sshll.u32 %s569_s29, 4  ;;  %s500_s5 = int_to_ptr.vmem [resolvable:$false] %s499_s5 }
  0x41   : > { %s501_s6 = scalar_lea.vmem %s500_s5, 32  ;;  %p502_p9 = scmp.lt.s32.totalorder %s714_s16, %s500_s5 }
  0x42   : > { %p498_p8 = pneg %p497_p12  ;;  %p503_p13 = scmp.lt.s32.totalorder %s501_s6, %s495_s26 }
  0x43   : > { %226 = vperm.xlu1 %451, %v703_v8  }
  0x44   : > { %p504_p1 = por %p503_p13, %p502_p9 }
  0x46   : > { %p505_p3 = pnand %p504_p1, %p498_p8 }
  0xbe   : > { %v224_v22 = vpop.permute.xlu1 %223 }
  0xbf   : > { %vm228_vm0 = vcmp.eq.s32.totalorder %v220_v18, %v224_v22  ;;  %vm229_vm1 = vcmp.eq.s32.totalorder %v221_v21, %v224_v22 }
  0xc0   : > { %v232_v26 = vsel %vm228_vm0, %v185_v1, 0.0  ;;  %v233_v27 = vsel %vm229_vm1, %v186_v2, 0.0 }
  0xc1   : > { %v236_v30 = vadd.f32 %v233_v27, %v232_v26 }
  0xc2   : > { %v227_v25 = vpop.permute.xlu1 %226 }
  0xc3   : > { %vm230_vm2 = vcmp.eq.s32.totalorder %v220_v18, %v227_v25  ;;  %vm231_vm3 = vcmp.eq.s32.totalorder %v221_v21, %v227_v25 }
  0xc4   : > { %v234_v33 = vsel %vm230_vm2, %v187_v3, 0.0  ;;  %v235_v34 = vsel %vm231_vm3, %v188_v5, 0.0 }
  0xc5   : > { %v239_v35 = vadd.f32 %v235_v34, %v234_v33 }
  0xc8   : > { %v193_v9 = vpop.xlane.xlu0 %192 }
  0xc9   : > { %v197_v10 = vsub.f32 %v185_v1, %v193_v9  ;;  %v198_v11 = vsub.f32 %v186_v2, %v193_v9 }
  0xcb   : > { %v201_v13 = vmul.f32 1.442695, %v197_v10  ;;  %v203_v14 = vmul.f32 1.442695, %v198_v11 }
  0xcc   : > { %v196_v15 = vpop.xlane.xlu0 %195 }
  0xcd   : > { %453 = vpow2.f32 %v201_v13  ;;  %v199_v16 = vsub.f32 %v187_v3, %v196_v15  ;;  %v200_v17 = vsub.f32 %v188_v5, %v196_v15 }
  0xce   : > { %455 = vpow2.f32 %v203_v14 }
  0xcf   : > { %v205_v19 = vmul.f32 1.442695, %v199_v16  ;;  %v207_v20 = vmul.f32 1.442695, %v200_v17 }
  0xd1   : > { %457 = vpow2.f32 %v205_v19 }
  0xd2   : > { %459 = vpow2.f32 %v207_v20 }
  0xd7   : > { %v454_v23 = vpop.eup %453 }
  0xd8   : > { %v456_v24 = vpop.eup %455 }
  0xd9   : > { %v209_v28 = vadd.f32 %v456_v24, %v454_v23 }
  0xdb   : > { %v458_v29 = vpop.eup %457  ;;  %210 = vadd.xlane.f32.xlu0 %v209_v28 }
  0xdc   : > { %v460_v31 = vpop.eup %459 }
  0xdd   : > { %v212_v32 = vadd.f32 %v460_v31, %v458_v29 }
  0xdf   : > { %237 = vadd.xlane.f32.xlu0 %v236_v30  ;;  %213 = vadd.xlane.f32.xlu1 %v212_v32 }
  0xe3   : > { %240 = vadd.xlane.f32.xlu0 %v239_v35 }
  0xf9   : > { %242 = vrot.lane.b32.xlu0 %v700_v6, %s567_s20 }
  0xfd   : > { %244 = vrot.lane.b32.xlu0 %v703_v8, %s567_s20 }
 0x168   : > { %v211_v36 = vpop.xlane.xlu0 %210 }
 0x169   : > { %461 = vlog2.f32 %v211_v36 }
 0x16c   : > { %v214_v37 = vpop.xlane.xlu1 %213  ;;  %v238_v38 = vpop.xlane.xlu0 %237 }
 0x16d   : > { %463 = vlog2.f32 %v214_v37 }
 0x170   : > { %v241_v39 = vpop.xlane.xlu0 %240 }
 0x173   : > { %v462_v40 = vpop.eup %461 }
 0x174   : > { %v216_v41 = vmul.f32 0.6931472, %v462_v40  ;;  %v243_v42 = vpop.permute.xlu0 %242 }
 0x175   : > { %vm246_vm4 = vcmp.eq.s32.totalorder %v700_v6, %v243_v42 }
 0x176   : > { %v256_v45 = vadd.f32 %v216_v41, %v193_v9  ;;  %v390_v47 = vsel %vm246_vm4, 1.0, %v568_v46 }
 0x177   : > { %v464_v49 = vpop.eup %463  ;;  %v252_v50 = vmul.f32 2.0, %v390_v47 }
 0x178   : > { %v218_v51 = vmul.f32 0.6931472, %v464_v49  ;;  %v258_v52 = vsub.f32 %v256_v45, %v238_v38  ;;  %v245_v53 = vpop.permute.xlu0 %244 }
 0x179   : > { %v254_v55 = vadd.f32 1.0, %v252_v50  ;;  %vm247_vm5 = vcmp.eq.s32.totalorder %v703_v8, %v245_v53 }
 0x17a   : > { %v257_v56 = vadd.f32 %v218_v51, %v196_v15  ;;  %v391_v57 = vsel %vm247_vm5, 1.0, %v568_v46 }
 0x17b   : > { %v260_v59 = vmul.f32 %v258_v52, %v254_v55  ;;  %v253_v60 = vmul.f32 2.0, %v391_v57 }
 0x17c   : > { %v259_v61 = vsub.f32 %v257_v56, %v241_v39 }
 0x17d   : > { %v255_v62 = vadd.f32 1.0, %v253_v60  ;;  %v271_v0 = vsel %vm269_vm6, %v260_v59, 0.0 }
 0x17e   : > { %v274_v2 = vsel %vm273_vm8, %v271_v0, 0.0 }
 0x17f   : > { %v261_v63 = vmul.f32 %v259_v61, %v255_v62 }
 0x181   : > { %v272_v1 = vsel %vm270_vm7, %v261_v63, 0.0 }
 0x182   : > { %v275_v3 = vsel %vm273_vm8, %v272_v1, 0.0 }
 0x183   : > { %v276_v4 = vadd.f32 %v275_v3, %v274_v2 }
 0x185   : > { %277 = vadd.xlane.f32.xlu1 %v276_v4 }
 0x212   : > { %v278_v5 = vpop.xlane.xlu1 %277 }
 0x213   : > { %v279_v6 = vrot.slane %v278_v5, 4 }
 0x215   : > { %v280_v7 = vadd.f32 %v279_v6, %v278_v5 }
 0x217   : > { %v281_v8 = vrot.slane %v280_v7, 2 }
 0x219   : > { %v282_v9 = vadd.f32 %v281_v8, %v280_v7 }
 0x21b   : > { %v283_v10 = vrot.slane %v282_v9, 1 }
 0x21d   : > { %v284_v11 = vadd.f32 %v283_v10, %v282_v9 }
 0x21f   : > { %398 = vpush %v284_v11 }
 0x250   : > { %s399_s17 = spop %398 }
 0x251   : > { %v286_v12 = vstv %s399_s17 }
 0x252   : > { %287 = vst [vmem:[%s177_s14] sm:$0x1] %v286_v12 }
 0x253   : > { %508 = shalt.err (!%p505_p3)
}
 0x254   : > { %s509_s13 = scalar_lea.hbm %s721_s24, 16  ;;  %s513_s30 = scalar_lea.hbm %s764_s2, 64 }
 0x255   : > { %p510_p4 = scmp.ne.s32.totalorder %s721_s24, %s509_s13  ;;  %p514_p2 = scmp.lt.u32.totalorder %s721_s24, %s764_s2 }
 0x256   : > { %p515_p7 = scmp.lt.u32.totalorder %s513_s30, %s509_s13  ;;  %p517_p6 = scmp.lt.u32.totalorder %s509_s13, %s721_s24 }
 0x257   : > { %p511_p5 = pnand %p510_p4, %p771_p11 }
 0x258   : > { %p516_p10 = por %p515_p7, %p514_p2 }
 0x259   : > { %p512_p0 = pneg %p511_p5 }
 0x25a   : > { %p518_p12 = por %p517_p6, %p516_p10 }
 0x25c   : > { %p519_p8 = pnand %p518_p12, %p512_p0 }
 0x25e   : > { %522 = shalt.err (!%p519_p8)
}
 0x25f   : > { %402 = dma.vmem_to_hbm [thread:$0]  (%p771_p11), %s714_s16, 16, %s721_s24, %s289_s25  }
 0x260 PF: > { %p413_p9 = scmp.ge.s32.totalorder %s561_s12, 2  ;;  %s313_s7 = sand.u32 1, %s549_s9  }
 0x261   : > { %p772_p13 = scmp.ne.s32.totalorder %s769_s22, 0  ;;  %s314_s20 = scalar_lea.sflag [#allocation4], %s313_s7 }
 0x263   : > { %p409_p1 = pnand %p413_p9, %p772_p13 }
 0x265   : > { %544 = dma.done.wait (!%p409_p1), %s314_s20, 16  }
 0x266   : > { %546 = vsyncadd (!%p409_p1), %s314_s20, 4294967280  ;;  %p15_p3 = scmp.ge.s32.totalorder %s610_s15, 6   ;;  %s773_s9 = smov %s553_s10 }
 0x267   : > { %s774_s10 = smov %s557_s11  ;;  %s775_s11 = smov %s622_s18 }
 0x268   : > { %s776_s12 = smov %s610_s15  ;;  %17 = sbr.rel (!%p15_p3) target bundleno = 5 (0x5), region = 76 }
 0x26f   :  { %318 = vsyncpa [#allocation3], 1 }
 0x270   :  { %320 = vsyncpa [#allocation3 + $0x1], 1 }
 0x271   :  { %321 = vsyncpa [#allocation4], 1 }
 0x272   :  { %323 = vsyncpa [#allocation4 + $0x1], 1 }

</bundles_post_ra>
